<compile_context>
chip_gen: v7x
topology: tpu7x:2x2x1
jax: 0.10.0
libtpu: 0.0.40
codegen_flags: <defaults>
</compile_context>

<pallas_src>
import functools

import numpy as np
import jax
import jax.numpy as jnp
from jax import lax
from jax.experimental import pallas as pl
from jax.experimental.pallas import tpu as pltpu


def _round_up(x, m):
    return -(-x // m) * m


# ---------------- Fused Bottleneck kernel (NB images per grid step) ----------------
def _bottleneck_kernel(x_ref, bn_ref, mask_ref, wcat_ref, w2f_ref, w3t_ref, out_ref,
                       *, cin, cout, wp, W, mm_dtype):
    """All activations are (channels, NB*H*W): channels on sublanes, lanes dense."""
    L = x_ref.shape[1]

    # ---- BN1 + ReLU (f32 VPU math) -------------------------------------------------
    y = jnp.maximum(x_ref[...] * bn_ref[:cin, 0:1] + bn_ref[:cin, 1:2], 0.0)

    # ---- shortcut 1x1 and conv1 1x1 (BN2 scale pre-folded) fused into ONE matmul ---
    z = jnp.dot(wcat_ref[...], y.astype(mm_dtype), preferred_element_type=jnp.float32)
    skip = z[:cout, :]                                          # (Cout, L)
    b = jnp.maximum(z[cout:cout + wp, :] + bn_ref[:wp, 2:3], 0.0)

    # ---- 3x3 conv, stride 1, pad 1 (BN3 scale pre-folded): 9 lane-rotated taps,
    #      multiplied by the precomputed boundary masks, stacked along sublanes and
    #      consumed by ONE K=9*wp matmul. --------------------------------------------
    taps = []
    for t in range(9):
        dh, dw = t // 3, t % 3
        off = (dh - 1) * W + (dw - 1)
        if off == 0:
            taps.append(b)                                      # centre tap, always valid
        else:
            tap = pltpu.roll(b, (-off) % L, axis=1)             # tap[:, p] == b[:, p+off]
            taps.append(tap * mask_ref[t:t + 1, :])             # zero out-of-image sources
    stacked = jnp.concatenate(taps, axis=0)                     # (9*wp, L)
    acc = jnp.dot(w2f_ref[...], stacked.astype(mm_dtype),
                  preferred_element_type=jnp.float32)           # (wp, L)

    # ---- BN3 shift + ReLU + conv3 1x1 + residual add -------------------------------
    c = jnp.maximum(acc + bn_ref[:wp, 3:4], 0.0)
    out_ref[...] = jnp.dot(w3t_ref[...], c.astype(mm_dtype),
                           preferred_element_type=jnp.float32) + skip


# ---------------- Wrapper ----------------------------------------------------------
def _tap_masks(H, W, NB):
    """(9, NB*H*W) f32 validity masks for the 9 taps of a 3x3 / pad=1 conv."""
    hw = H * W
    h = np.arange(hw) // W
    w = np.arange(hw) % W
    rows = []
    for dh in range(3):
        for dw in range(3):
            rows.append(((h + dh >= 1) & (h + dh <= H) &
                         (w + dw >= 1) & (w + dw <= W)).astype(np.float32))
    return jnp.asarray(np.tile(np.stack(rows, 0), (1, NB)))


def bottleneck_forward(x_nchw, p, *, images_per_block=None, matmul_dtype=jnp.float32):
    N, Cin, H, W = x_nchw.shape
    HW = H * W
    width = p['w1'].shape[1]
    Cout = p['wsc'].shape[1]
    wp = _round_up(width, 8)                    # pad width so sublane slices are full

    # ---- image blocking: NB images folded into the lane axis per grid step ---------
    if images_per_block is None:
        # Big lane blocks for MXU utilization, but keep >=4 grid steps when possible
        # so v7x's two TensorCores both get work and DMA still pipelines.
        images_per_block = max(1, min(64, _round_up(N, 4) // 4))
    NB = max(1, min(images_per_block, N))
    G = -(-N // NB)
    Npad = G * NB
    L = NB * HW

    if Npad != N:
        x_nchw = jnp.pad(x_nchw, ((0, Npad - N), (0, 0), (0, 0), (0, 0)))

    # Lane-dense layout: channels on sublanes, (image, pixel) on lanes.
    x2 = x_nchw.reshape(Npad, Cin, HW).transpose(1, 0, 2).reshape(Cin, Npad * HW)

    # ---- one-time weight folding (BN2/BN3 scales into conv weights) ----------------
    mm = matmul_dtype
    w1s = jnp.pad(p['w1'] * p['scale2'][None, :], ((0, 0), (0, wp - width)))
    wcat_t = jnp.concatenate([p['wsc'], w1s], axis=1).T              # (Cout+wp, Cin)
    rows = Cout + wp
    rows_pad = _round_up(rows, 8)
    wcat_t = jnp.pad(wcat_t, ((0, rows_pad - rows), (0, 0))).astype(mm)

    w2s = jnp.pad(p['w2'] * p['scale3'][None, None, None, :],
                  ((0, 0), (0, 0), (0, wp - width), (0, wp - width)))
    w2flat = jnp.transpose(w2s.reshape(9, wp, wp), (2, 0, 1)).reshape(wp, 9 * wp)
    w2flat = w2flat.astype(mm)                                       # (wp, 9*wp)

    w3t = jnp.pad(p['w3'], ((0, wp - width), (0, 0))).T.astype(mm)   # (Cout, wp)

    # ---- pack the six BN vectors into one small operand ----------------------------
    m_rows = max(_round_up(Cin, 8), wp)
    pad1 = lambda v: jnp.pad(v.astype(jnp.float32), (0, m_rows - v.shape[0]))
    bn = jnp.stack([pad1(p['scale1']), pad1(p['shift1']),
                    pad1(p['shift2']), pad1(p['shift3'])], axis=1)   # (m_rows, 4)

    mask = _tap_masks(H, W, NB)                                      # (9, L)

    # ---- VMEM budget (v7x has 64 MiB physical per TensorCore) ----------------------
    est = 4 * L * (2 * Cin + 2 * Cout + 9                     # pipelined in/out + mask
                   + Cin + rows_pad + Cout + 9 * wp + 3 * wp)  # live intermediates
    vmem_limit = int(min(64 * 2 ** 20, max(32 * 2 ** 20, 2 * est)))

    kern = functools.partial(_bottleneck_kernel, cin=Cin, cout=Cout, wp=wp,
                             W=W, mm_dtype=mm)
    out = pl.pallas_call(
        kern,
        out_shape=jax.ShapeDtypeStruct((Cout, Npad * HW), jnp.float32),
        grid=(G,),
        in_specs=[
            pl.BlockSpec((Cin, L), lambda i: (0, i)),
            pl.BlockSpec((m_rows, 4), lambda i: (0, 0)),
            pl.BlockSpec((9, L), lambda i: (0, 0)),
            pl.BlockSpec((rows_pad, Cin), lambda i: (0, 0)),
            pl.BlockSpec((wp, 9 * wp), lambda i: (0, 0)),
            pl.BlockSpec((Cout, wp), lambda i: (0, 0)),
        ],
        out_specs=pl.BlockSpec((Cout, L), lambda i: (0, i)),
        compiler_params=pltpu.CompilerParams(
            dimension_semantics=("parallel",),
            vmem_limit_bytes=vmem_limit),
    )(x2, bn, mask, wcat_t, w2flat, w3t)

    # Back to NCHW (wrapper-side layout plumbing, outside the kernel).
    out = out.reshape(Cout, Npad, HW).transpose(1, 0, 2)[:N]
    return out.reshape(N, Cout, H, W)


# ---------------- Pure-JAX reference (for self-check) -------------------------------
def reference(x_nchw, p):
    x = jnp.transpose(x_nchw, (0, 2, 3, 1))
    y = jnp.maximum(x * p['scale1'] + p['shift1'], 0.0)
    skip = jnp.einsum('nhwc,cd->nhwd', y, p['wsc'])
    a = jnp.einsum('nhwc,cd->nhwd', y, p['w1'])
    b = jnp.maximum(a * p['scale2'] + p['shift2'], 0.0)
    c0 = lax.conv_general_dilated(
        b, p['w2'], window_strides=(1, 1), padding='SAME',
        dimension_numbers=('NHWC', 'HWIO', 'NHWC'))
    c = jnp.maximum(c0 * p['scale3'] + p['shift3'], 0.0)
    out = jnp.einsum('nhwc,cd->nhwd', c, p['w3']) + skip
    return jnp.transpose(out, (0, 3, 1, 2))


if __name__ == "__main__":
    key = jax.random.PRNGKey(0)
    keys = jax.random.split(key, 8)

    # Bottleneck(in_channels=8, channels=4) -> width=4, out=channels*4=16
    N, Cin, H, W = 2, 8, 16, 16
    channels = 4
    width = channels                 # groups=1, width_per_group=64
    Cout = channels * 4              # expansion = 4

    x = jax.random.normal(keys[0], (N, Cin, H, W), jnp.float32)

    def bn_params(k, c):
        k1, k2, k3, k4 = jax.random.split(k, 4)
        gamma = jax.random.uniform(k1, (c,), jnp.float32, 0.5, 1.5)
        beta = 0.1 * jax.random.normal(k2, (c,), jnp.float32)
        mean = 0.1 * jax.random.normal(k3, (c,), jnp.float32)
        var = jax.random.uniform(k4, (c,), jnp.float32, 0.5, 1.5)
        scale = gamma / jnp.sqrt(var + 1e-5)
        shift = beta - mean * scale
        return scale, shift

    s1, sh1 = bn_params(keys[1], Cin)
    s2, sh2 = bn_params(keys[2], width)
    s3, sh3 = bn_params(keys[3], width)

    params = dict(
        scale1=s1, shift1=sh1, scale2=s2, shift2=sh2, scale3=s3, shift3=sh3,
        # 1x1 conv weights stored as (in, out); 3x3 as (KH, KW, in, out)
        wsc=0.1 * jax.random.normal(keys[4], (Cin, Cout), jnp.float32),
        w1=0.1 * jax.random.normal(keys[5], (Cin, width), jnp.float32),
        w2=0.1 * jax.random.normal(keys[6], (3, 3, width, width), jnp.float32),
        w3=0.1 * jax.random.normal(keys[7], (width, Cout), jnp.float32),
    )

    ref = reference(x, params)

    # f32 MXU operands; both images folded into one lane block (L = N*H*W = 512).
    out = bottleneck_forward(x, params, images_per_block=2)
    jax.block_until_ready(out)
    assert out.shape == (N, Cout, H, W)
    assert jnp.allclose(out, ref, atol=1e-4, rtol=1e-4)

    # bf16 MXU operands with f32 accumulation (recommended on v6e/v7x for large
    # batches); one image per grid step exercises the multi-step / parallel path.
    out_bf16 = bottleneck_forward(x, params, images_per_block=1,
                                  matmul_dtype=jnp.bfloat16)
    jax.block_until_ready(out_bf16)
    assert jnp.allclose(out_bf16, ref, atol=2e-2, rtol=2e-2)

    print("KERNEL_OK")
</pallas_src>

<mosaic_0001>
module attributes {stable_mosaic.version = 11 : i64} {
  func.func @_bottleneck_kernel(%arg0: i32, %arg1: memref<8x512xf32, #tpu.memory_space<vmem>>, %arg2: memref<8x4xf32, #tpu.memory_space<vmem>>, %arg3: memref<9x512xf32, #tpu.memory_space<vmem>>, %arg4: memref<24x8xf32, #tpu.memory_space<vmem>>, %arg5: memref<8x72xf32, #tpu.memory_space<vmem>>, %arg6: memref<16x8xf32, #tpu.memory_space<vmem>>, %arg7: memref<16x512xf32, #tpu.memory_space<vmem>>) attributes {dimension_semantics = [#tpu.dimension_semantics<parallel>], iteration_bounds = array<i64: 1>, scalar_prefetch = 0 : i64, scratch_operands = 0 : i64, tpu.core_type = #tpu.core_type<tc>, window_params = [{transform_indices = @transform_0, window_bounds = array<i64: 8, 512>}, {pipeline_mode = #tpu.pipeline_mode<synchronous>, transform_indices = @transform_1, window_bounds = array<i64: 8, 4>}, {pipeline_mode = #tpu.pipeline_mode<synchronous>, transform_indices = @transform_2, window_bounds = array<i64: 9, 512>}, {pipeline_mode = #tpu.pipeline_mode<synchronous>, transform_indices = @transform_3, window_bounds = array<i64: 24, 8>}, {pipeline_mode = #tpu.pipeline_mode<synchronous>, transform_indices = @transform_4, window_bounds = array<i64: 8, 72>}, {pipeline_mode = #tpu.pipeline_mode<synchronous>, transform_indices = @transform_5, window_bounds = array<i64: 16, 8>}, {transform_indices = @transform_6, window_bounds = array<i64: 16, 512>}]} {
    %c0 = arith.constant 0 : index
    %c0_0 = arith.constant 0 : index
    %0 = vector.load %arg1[%c0, %c0_0] : memref<8x512xf32, #tpu.memory_space<vmem>>, vector<8x512xf32>
    %c0_1 = arith.constant 0 : index
    %c0_2 = arith.constant 0 : index
    %1 = vector.load %arg2[%c0_1, %c0_2] : memref<8x4xf32, #tpu.memory_space<vmem>>, vector<8x1xf32>
    %2 = vector.broadcast %1 : vector<8x1xf32> to vector<8x512xf32>
    %3 = arith.mulf %0, %2 : vector<8x512xf32>
    %c0_3 = arith.constant 0 : index
    %c1 = arith.constant 1 : index
    %4 = vector.load %arg2[%c0_3, %c1] : memref<8x4xf32, #tpu.memory_space<vmem>>, vector<8x1xf32>
    %5 = vector.broadcast %4 : vector<8x1xf32> to vector<8x512xf32>
    %6 = arith.addf %3, %5 : vector<8x512xf32>
    %cst = arith.constant 0.000000e+00 : f32
    %7 = vector.broadcast %cst : f32 to vector<8x512xf32>
    %8 = arith.maximumf %6, %7 : vector<8x512xf32>
    %c0_4 = arith.constant 0 : index
    %c0_5 = arith.constant 0 : index
    %9 = vector.load %arg4[%c0_4, %c0_5] : memref<24x8xf32, #tpu.memory_space<vmem>>, vector<24x8xf32>
    %cst_6 = arith.constant dense<0.000000e+00> : vector<24x512xf32>
    %10 = tpu.matmul %9, %8, %cst_6 {dimension_numbers = #tpu.dot_dimension_numbers<[1], [0], [0], [1], [0, 0, 1, 1], [], []>} : vector<24x8xf32>, vector<8x512xf32>, vector<24x512xf32> -> vector<24x512xf32>
    %11 = vector.extract_strided_slice %10 {offsets = [0, 0], sizes = [16, 512], strides = [1, 1]} : vector<24x512xf32> to vector<16x512xf32>
    %12 = vector.extract_strided_slice %10 {offsets = [16, 0], sizes = [8, 512], strides = [1, 1]} : vector<24x512xf32> to vector<8x512xf32>
    %c0_7 = arith.constant 0 : index
    %c2 = arith.constant 2 : index
    %13 = vector.load %arg2[%c0_7, %c2] : memref<8x4xf32, #tpu.memory_space<vmem>>, vector<8x1xf32>
    %14 = vector.broadcast %13 : vector<8x1xf32> to vector<8x512xf32>
    %15 = arith.addf %12, %14 : vector<8x512xf32>
    %cst_8 = arith.constant 0.000000e+00 : f32
    %16 = vector.broadcast %cst_8 : f32 to vector<8x512xf32>
    %17 = arith.maximumf %15, %16 : vector<8x512xf32>
    %c17_i32 = arith.constant 17 : i32
    %18 = tpu.dynamic_rotate %17 by %c17_i32 dim 1 : vector<8x512xf32>, i32 -> vector<8x512xf32>
    %c0_9 = arith.constant 0 : index
    %c0_10 = arith.constant 0 : index
    %19 = vector.load %arg3[%c0_9, %c0_10] : memref<9x512xf32, #tpu.memory_space<vmem>>, vector<1x512xf32>
    %20 = vector.broadcast %19 : vector<1x512xf32> to vector<8x512xf32>
    %21 = arith.mulf %18, %20 : vector<8x512xf32>
    %c16_i32 = arith.constant 16 : i32
    %22 = tpu.dynamic_rotate %17 by %c16_i32 dim 1 : vector<8x512xf32>, i32 -> vector<8x512xf32>
    %c1_11 = arith.constant 1 : index
    %c0_12 = arith.constant 0 : index
    %23 = vector.load %arg3[%c1_11, %c0_12] : memref<9x512xf32, #tpu.memory_space<vmem>>, vector<1x512xf32>
    %24 = vector.broadcast %23 : vector<1x512xf32> to vector<8x512xf32>
    %25 = arith.mulf %22, %24 : vector<8x512xf32>
    %c15_i32 = arith.constant 15 : i32
    %26 = tpu.dynamic_rotate %17 by %c15_i32 dim 1 : vector<8x512xf32>, i32 -> vector<8x512xf32>
    %c2_13 = arith.constant 2 : index
    %c0_14 = arith.constant 0 : index
    %27 = vector.load %arg3[%c2_13, %c0_14] : memref<9x512xf32, #tpu.memory_space<vmem>>, vector<1x512xf32>
    %28 = vector.broadcast %27 : vector<1x512xf32> to vector<8x512xf32>
    %29 = arith.mulf %26, %28 : vector<8x512xf32>
    %c1_i32 = arith.constant 1 : i32
    %30 = tpu.dynamic_rotate %17 by %c1_i32 dim 1 : vector<8x512xf32>, i32 -> vector<8x512xf32>
    %c3 = arith.constant 3 : index
    %c0_15 = arith.constant 0 : index
    %31 = vector.load %arg3[%c3, %c0_15] : memref<9x512xf32, #tpu.memory_space<vmem>>, vector<1x512xf32>
    %32 = vector.broadcast %31 : vector<1x512xf32> to vector<8x512xf32>
    %33 = arith.mulf %30, %32 : vector<8x512xf32>
    %c511_i32 = arith.constant 511 : i32
    %34 = tpu.dynamic_rotate %17 by %c511_i32 dim 1 : vector<8x512xf32>, i32 -> vector<8x512xf32>
    %c5 = arith.constant 5 : index
    %c0_16 = arith.constant 0 : index
    %35 = vector.load %arg3[%c5, %c0_16] : memref<9x512xf32, #tpu.memory_space<vmem>>, vector<1x512xf32>
    %36 = vector.broadcast %35 : vector<1x512xf32> to vector<8x512xf32>
    %37 = arith.mulf %34, %36 : vector<8x512xf32>
    %c497_i32 = arith.constant 497 : i32
    %38 = tpu.dynamic_rotate %17 by %c497_i32 dim 1 : vector<8x512xf32>, i32 -> vector<8x512xf32>
    %c6 = arith.constant 6 : index
    %c0_17 = arith.constant 0 : index
    %39 = vector.load %arg3[%c6, %c0_17] : memref<9x512xf32, #tpu.memory_space<vmem>>, vector<1x512xf32>
    %40 = vector.broadcast %39 : vector<1x512xf32> to vector<8x512xf32>
    %41 = arith.mulf %38, %40 : vector<8x512xf32>
    %c496_i32 = arith.constant 496 : i32
    %42 = tpu.dynamic_rotate %17 by %c496_i32 dim 1 : vector<8x512xf32>, i32 -> vector<8x512xf32>
    %c7 = arith.constant 7 : index
    %c0_18 = arith.constant 0 : index
    %43 = vector.load %arg3[%c7, %c0_18] : memref<9x512xf32, #tpu.memory_space<vmem>>, vector<1x512xf32>
    %44 = vector.broadcast %43 : vector<1x512xf32> to vector<8x512xf32>
    %45 = arith.mulf %42, %44 : vector<8x512xf32>
    %c495_i32 = arith.constant 495 : i32
    %46 = tpu.dynamic_rotate %17 by %c495_i32 dim 1 : vector<8x512xf32>, i32 -> vector<8x512xf32>
    %c8 = arith.constant 8 : index
    %c0_19 = arith.constant 0 : index
    %47 = vector.load %arg3[%c8, %c0_19] : memref<9x512xf32, #tpu.memory_space<vmem>>, vector<1x512xf32>
    %48 = vector.broadcast %47 : vector<1x512xf32> to vector<8x512xf32>
    %49 = arith.mulf %46, %48 : vector<8x512xf32>
    %50 = tpu.concatenate %21, %25, %29, %33, %17, %37, %41, %45, %49 in 0 : vector<8x512xf32>, vector<8x512xf32>, vector<8x512xf32>, vector<8x512xf32>, vector<8x512xf32>, vector<8x512xf32>, vector<8x512xf32>, vector<8x512xf32>, vector<8x512xf32> -> vector<72x512xf32>
    %c0_20 = arith.constant 0 : index
    %c0_21 = arith.constant 0 : index
    %51 = vector.load %arg5[%c0_20, %c0_21] : memref<8x72xf32, #tpu.memory_space<vmem>>, vector<8x72xf32>
    %cst_22 = arith.constant dense<0.000000e+00> : vector<8x512xf32>
    %52 = tpu.matmul %51, %50, %cst_22 {dimension_numbers = #tpu.dot_dimension_numbers<[1], [0], [0], [1], [0, 0, 1, 1], [], []>} : vector<8x72xf32>, vector<72x512xf32>, vector<8x512xf32> -> vector<8x512xf32>
    %c0_23 = arith.constant 0 : index
    %c3_24 = arith.constant 3 : index
    %53 = vector.load %arg2[%c0_23, %c3_24] : memref<8x4xf32, #tpu.memory_space<vmem>>, vector<8x1xf32>
    %54 = vector.broadcast %53 : vector<8x1xf32> to vector<8x512xf32>
    %55 = arith.addf %52, %54 : vector<8x512xf32>
    %cst_25 = arith.constant 0.000000e+00 : f32
    %56 = vector.broadcast %cst_25 : f32 to vector<8x512xf32>
    %57 = arith.maximumf %55, %56 : vector<8x512xf32>
    %c0_26 = arith.constant 0 : index
    %c0_27 = arith.constant 0 : index
    %58 = vector.load %arg6[%c0_26, %c0_27] : memref<16x8xf32, #tpu.memory_space<vmem>>, vector<16x8xf32>
    %cst_28 = arith.constant dense<0.000000e+00> : vector<16x512xf32>
    %59 = tpu.matmul %58, %57, %cst_28 {dimension_numbers = #tpu.dot_dimension_numbers<[1], [0], [0], [1], [0, 0, 1, 1], [], []>} : vector<16x8xf32>, vector<8x512xf32>, vector<16x512xf32> -> vector<16x512xf32>
    %60 = arith.addf %59, %11 : vector<16x512xf32>
    %c0_29 = arith.constant 0 : index
    %c0_30 = arith.constant 0 : index
    %61 = vector.load %arg7[%c0_29, %c0_30] : memref<16x512xf32, #tpu.memory_space<vmem>>, vector<16x512xf32>
    tpu.vector_store %arg7[%c0_29, %c0_30], %60 {strides = array<i32>} : memref<16x512xf32, #tpu.memory_space<vmem>>, vector<16x512xf32>,
    return
  }
  func.func @transform_0(%arg0: i32) -> (i32, i32) {
    %c0_i32 = arith.constant 0 : i32
    %c0_i32_0 = arith.constant 0 : i32
    return %c0_i32, %arg0 : i32, i32
  }
  func.func @transform_1(%arg0: i32) -> (i32, i32) {
    %c0_i32 = arith.constant 0 : i32
    %c0_i32_0 = arith.constant 0 : i32
    %c0_i32_1 = arith.constant 0 : i32
    return %c0_i32, %c0_i32_0 : i32, i32
  }
  func.func @transform_2(%arg0: i32) -> (i32, i32) {
    %c0_i32 = arith.constant 0 : i32
    %c0_i32_0 = arith.constant 0 : i32
    %c0_i32_1 = arith.constant 0 : i32
    return %c0_i32, %c0_i32_0 : i32, i32
  }
  func.func @transform_3(%arg0: i32) -> (i32, i32) {
    %c0_i32 = arith.constant 0 : i32
    %c0_i32_0 = arith.constant 0 : i32
    %c0_i32_1 = arith.constant 0 : i32
    return %c0_i32, %c0_i32_0 : i32, i32
  }
  func.func @transform_4(%arg0: i32) -> (i32, i32) {
    %c0_i32 = arith.constant 0 : i32
    %c0_i32_0 = arith.constant 0 : i32
    %c0_i32_1 = arith.constant 0 : i32
    return %c0_i32, %c0_i32_0 : i32, i32
  }
  func.func @transform_5(%arg0: i32) -> (i32, i32) {
    %c0_i32 = arith.constant 0 : i32
    %c0_i32_0 = arith.constant 0 : i32
    %c0_i32_1 = arith.constant 0 : i32
    return %c0_i32, %c0_i32_0 : i32, i32
  }
  func.func @transform_6(%arg0: i32) -> (i32, i32) {
    %c0_i32 = arith.constant 0 : i32
    %c0_i32_0 = arith.constant 0 : i32
    return %c0_i32, %arg0 : i32, i32
  }
}

</mosaic_0001>

<bundles_post_ra>
// kernel: tpu_custom_call.1
= control target key start
LH: loop header
LB: loop body
LE: loop exit
PB: predicated region body
PF: predicated region fallthrough
CT: control target
= control target key end

     0   :  { %11 = vsyncpa [#allocation3], 0  ;;  %s1351_s0 = inlined_call_operand.hbm [shape: f32[8,512], index: 0, kind: input, shape index: {}]   ;;  %s1352_s1 = inlined_call_operand.vmem [shape: f32[8,4], index: 1, kind: input, shape index: {}]   ;;  %s1353_s2 = inlined_call_operand.vmem [shape: f32[9,512], index: 2, kind: input, shape index: {}]   ;;  %s1354_s3 = inlined_call_operand.vmem [shape: f32[24,8], index: 3, kind: input, shape index: {}]   ;;  %s1355_s4 = inlined_call_operand.vmem [shape: f32[8,72], index: 4, kind: input, shape index: {}]   ;;  %s1356_s5 = inlined_call_operand.vmem [shape: f32[16,8], index: 5, kind: input, shape index: {}]   ;;  %s1357_s6 = inlined_call_operand.hbm [shape: f32[16,512], index: 6, kind: output, shape index: {}]  }
   0x1   :  { %12 = vsyncpa [#allocation4], 0  ;;  %s1044_s21 = smov [#allocation2]   ;;  %s996_s25 = scalar_lea.hbm %s1351_s0, 512 }
   0x2   :  { %s19_s22 = sshll.u32 %s1044_s21, 4  ;;  %p997_p0 = scmp.ne.s32.totalorder %s1351_s0, %s996_s25  ;;  %s20_s22 = int_to_ptr.vmem [resolvable:$true] %s19_s22 }
   0x3   :  { %p1000_p1 = scmp.lt.u32.totalorder %s996_s25, %s1351_s0 }
   0x5   :  { %p1002_p2 = pnand %p1000_p1, %p997_p0 }
   0x7   :  { %1005 = shalt.err (!%p1002_p2)
}
   0x8   :  { %s1006_s30 = scalar_lea.vmem %s20_s22, 512  ;;  %p1011_p4 = scmp.lt.s32.totalorder %s20_s22, %s20_s22 }
   0x9   :  { %p1007_p3 = scmp.ne.s32.totalorder %s20_s22, %s1006_s30  ;;  %p1012_p5 = scmp.lt.s32.totalorder %s1006_s30, %s1006_s30 }
   0xb   :  { %p1013_p6 = por %p1012_p5, %p1011_p4 }
   0xd   :  { %p1014_p7 = pnand %p1013_p6, %p1007_p3 }
   0xf   :  { %1017 = shalt.err (!%p1014_p7)
}
  0x10   :  { %22 = dma.hbm_to_vmem [thread:$0]  %s1351_s0, 512, %s20_s22, [#allocation3]  }
  0x11   :  { %1040 = dma.done.wait [#allocation3], 512  }
  0x12   :  { %1041 = vsyncadd [#allocation3], 4294966784  ;;  %v1045_v0 = vmov 0   ;;  %v1111_v1 = vld [vmem:[%s1352_s1] sm:$0xff]  ;;  %v1046_v2 = vmov 1   ;;  %v1047_v3 = vmov 0.0   ;;  %v261_v40 = vlaneseq }
  0x13   :  { %992 = vset.pattern.permute.xlu0 %v1045_v0  ;;  %139 = vmatprep.mubr.f32.mxu0 %v1047_v3  ;;  %v1048_v4 = vmov 2   ;;  %v37_v6 = vld [vmem:[#allocation2 + $0x8] sm:$0xff]  ;;  %v39_v7 = vld [vmem:[#allocation2 + $0x18] sm:$0xff]  ;;  %v36_v8 = vld [vmem:[#allocation2] sm:$0xff]  ;;  %vm65_vm0 = vcmask 64512   ;;  %s1050_s15 = smov 16  }
  0x14   :  { %43 = vperm.xlu0 %992, %v1111_v1   ;;  %222 = vmatprep.mubr.f32.mxu1 %v1047_v3  ;;  %v38_v9 = vld [vmem:[#allocation2 + $0x10] sm:$0xff]  ;;  %v62_v23 = vld [vmem:[%s1354_s3] sm:$0xff]  ;;  %v63_v24 = vld [vmem:[%s1354_s3 + $0x8] sm:$0xff]  ;;  %s1051_s16 = smov 15   ;;  %s1052_s17 = smov 1   ;;  %v1057_v39 = vmov 3  }
  0x15   :  { %994 = vset.pattern.permute.xlu1 %v1048_v4  ;;  %v64_v25 = vld [vmem:[%s1354_s3 + $0x10] sm:$0xff]  ;;  %s1049_s3 = smov 17   ;;  %s1053_s18 = smov 127   ;;  %v271_v43 = vshrl.u32 %v261_v40, 7  ;;  %v1180_v45 = vand.u32 127, %v261_v40  ;;  %vm579_vm9 = vcmask 588800  }
  0x16   :  { %242 = vperm.xlu1 %994, %v1111_v1   ;;  %s1054_s19 = smov 113   ;;  %s1055_s20 = smov 112   ;;  %v268_v48 = vld [vmem:[%s1353_s2] ss:$8 sm:$0xf] }
  0x17   :  { %s1056_s21 = smov 111   ;;  %v1182_v47 = vsub.s32 1, %v271_v43  ;;  %v922_v49 = vld [vmem:[%s1353_s2 + $0x1] ss:$8 sm:$0xf]  ;;  %vm263_vm1 = vcmp.lt.s32.totalorder %v1180_v45, 17 }
  0x18   :  { %993 = vset.pattern.permute.xlu0 %v1046_v2  ;;  %v1191_v51 = vsub.s32 0, %v271_v43  ;;  %v1193_v53 = vsub.s32 3, %v271_v43  ;;  %vm302_vm2 = vcmp.lt.s32.totalorder %v1180_v45, 16  ;;  %v1198_v56 = vsub.s32 2, %v271_v43 }
  0x19   :  { %51 = vperm.xlu0 %993, %v1111_v1   ;;  %v277_v54 = vrot.slane %v268_v48, %v1182_v47  ;;  %v317_v55 = vrot.slane %v922_v49, %v1182_v47  ;;  %vm342_vm3 = vcmp.lt.s32.totalorder %v1180_v45, 15  ;;  %vm382_vm4 = vcmp.lt.s32.totalorder %v1180_v45, 1 }
  0x1a   :  { %v273_v58 = vrot.slane %v268_v48, %v1191_v51  ;;  %v285_v61 = vrot.slane %v268_v48, %v1193_v53  ;;  %v321_v62 = vrot.slane %v922_v49, %v1198_v56  ;;  %v313_v0 = vrot.slane %v922_v49, %v1191_v51 }
  0x1b   :  { %vm422_vm5 = vcmp.lt.s32.totalorder %v1180_v45, 127  ;;  %vm462_vm6 = vcmp.lt.s32.totalorder %v1180_v45, 113  ;;  %vm502_vm7 = vcmp.lt.s32.totalorder %v1180_v45, 112  ;;  %vm542_vm8 = vcmp.lt.s32.totalorder %v1180_v45, 111 }
  0x1d   :  { %995 = vset.pattern.permute.xlu0 %v1057_v39 }
  0x93   :  { %v44_v5 = vpop.permute.xlu0 %43 }
  0x94   :  { %v47_v10 = vmul.f32 %v44_v5, %v37_v6  ;;  %v49_v11 = vmul.f32 %v44_v5, %v39_v7  ;;  %v46_v12 = vmul.f32 %v44_v5, %v36_v8  ;;  %v48_v13 = vmul.f32 %v44_v5, %v38_v9 }
  0x95   :  { %v243_v26 = vpop.permute.xlu1 %242  ;;  %v325_v5 = vrot.slane %v922_v49, %v1193_v53  ;;  %v281_v6 = vrot.slane %v268_v48, %v1198_v56 }
  0x98   :  { %v52_v14 = vpop.permute.xlu0 %51 }
  0x99   :  { %v55_v15 = vadd.f32 %v52_v14, %v47_v10  ;;  %v57_v16 = vadd.f32 %v52_v14, %v49_v11  ;;  %v54_v17 = vadd.f32 %v52_v14, %v46_v12  ;;  %v56_v18 = vadd.f32 %v52_v14, %v48_v13 }
  0x9b   :  { %v59_v19 = vmax.f32 %v55_v15, 0.0  ;;  %v61_v20 = vmax.f32 %v57_v16, 0.0  ;;  %v58_v21 = vmax.f32 %v54_v17, 0.0  ;;  %v60_v22 = vmax.f32 %v56_v18, 0.0 }
  0x9d   :  { %75 = vmatprep.subr.mxu0 %v59_v19  ;;  %158 = vmatprep.subr.mxu1 %v61_v20 }
  0x9e   :  { %76 = vmatpush1.msra.mxu0 %v58_v21  ;;  %159 = vmatpush1.msra.mxu1 %v60_v22 }
  0x9f   :  { %916 = vmatmul.mubr.msk.f32.vlgmr.msra.gmra.mrb[0].mxu0 %vm65_vm0, %v62_v23  ;;  %919 = vmatmul.mubr.msk.f32.vlgmr.msra.gmra.mrb[0].mxu1 %vm65_vm0, %v62_v23 }
  0xa0   :  { %145 = vmatprep.mubr.f32.mxu0 %v1047_v3  ;;  %228 = vmatprep.mubr.f32.mxu1 %v1047_v3 }
  0xa3   :  { %917 = vmatmul.mubr.msk.f32.gmra.mrb[2].mxu0 %vm65_vm0, %v63_v24  ;;  %920 = vmatmul.mubr.msk.f32.gmra.mrb[2].mxu1 %vm65_vm0, %v63_v24 }
  0xa4   :  { %151 = vmatprep.mubr.f32.mxu0 %v1047_v3  ;;  %234 = vmatprep.mubr.f32.mxu1 %v1047_v3 }
  0xa7   :  { %918 = vmatmul.mubr.msk.f32.gmra.mrb[4].mxu0 %vm65_vm0, %v64_v25  ;;  %921 = vmatmul.mubr.msk.f32.gmra.mrb[4].mxu1 %vm65_vm0, %v64_v25 }
  0xa8   :  { %647 = vmatprep.mubr.f32.mxu0 %v1047_v3  ;;  %718 = vmatprep.mubr.f32.mxu1 %v1047_v3 }
 0x17a   :  { %v153_v27 = vpop.f32.mrb[4].mxu0  ;;  %v236_v28 = vpop.f32.mrb[4].mxu1 }
 0x17b   :  { %v245_v29 = vadd.f32 %v243_v26, %v153_v27  ;;  %v247_v30 = vadd.f32 %v243_v26, %v236_v28  ;;  %v155_v31 = vpop.f32.mrb[5].mxu0  ;;  %v238_v32 = vpop.f32.mrb[5].mxu1  ;;  %v924_v27 = vld [vmem:[%s1353_s2 + $0x3] ss:$8 sm:$0xf] }
 0x17c   :  { %v246_v35 = vadd.f32 %v243_v26, %v155_v31  ;;  %v248_v37 = vadd.f32 %v243_v26, %v238_v32  ;;  %v923_v26 = vld [vmem:[%s1353_s2 + $0x2] ss:$8 sm:$0xf]  ;;  %v397_v31 = vrot.slane %v924_v27, %v1182_v47  ;;  %v393_v43 = vrot.slane %v924_v27, %v1191_v51 }
 0x17d   :  { %v1139_v33 = vmax.f32 %v245_v29, 0.0  ;;  %v1141_v34 = vmax.f32 %v247_v30, 0.0  ;;  %v357_v30 = vrot.slane %v923_v26, %v1182_v47  ;;  %v365_v40 = vrot.slane %v923_v26, %v1193_v53 }
 0x17e   :  { %v1145_v36 = vmax.f32 %v246_v35, 0.0  ;;  %v1149_v38 = vmax.f32 %v248_v37, 0.0  ;;  %v353_v35 = vrot.slane %v923_v26, %v1191_v51 }
 0x17f   :  { %257 = vrot.lane.b32.xlu0 %v1141_v34, %s1049_s3  ;;  %253 = vrot.lane.b32.xlu1 %v1139_v33, %s1049_s3 }
 0x183   :  { %294 = vrot.lane.b32.xlu0 %v1139_v33, %s1050_s15  ;;  %255 = vrot.lane.b32.xlu1 %v1145_v36, %s1049_s3 }
 0x187   :  { %298 = vrot.lane.b32.xlu0 %v1141_v34, %s1050_s15  ;;  %259 = vrot.lane.b32.xlu1 %v1149_v38, %s1049_s3 }
 0x18b   :  { %334 = vrot.lane.b32.xlu0 %v1139_v33, %s1051_s16  ;;  %296 = vrot.lane.b32.xlu1 %v1145_v36, %s1050_s15 }
 0x18f   :  { %338 = vrot.lane.b32.xlu0 %v1141_v34, %s1051_s16  ;;  %300 = vrot.lane.b32.xlu1 %v1149_v38, %s1050_s15  ;;  %s1058_s15 = smov [#allocation5]  }
 0x193   :  { %374 = vrot.lane.b32.xlu0 %v1139_v33, %s1052_s17  ;;  %336 = vrot.lane.b32.xlu1 %v1145_v36, %s1051_s16 }
 0x197   :  { %378 = vrot.lane.b32.xlu0 %v1141_v34, %s1052_s17  ;;  %340 = vrot.lane.b32.xlu1 %v1149_v38, %s1051_s16  ;;  %s904_s16 = sshll.u32 %s1058_s15, 4  ;;  %s905_s16 = int_to_ptr.vmem [resolvable:$true] %s904_s16 }
 0x198   :  { %p1023_p9 = scmp.lt.s32.totalorder %s905_s16, %s905_s16 }
 0x19b   :  { %414 = vrot.lane.b32.xlu0 %v1139_v33, %s1053_s18  ;;  %376 = vrot.lane.b32.xlu1 %v1145_v36, %s1052_s17 }
 0x19f   :  { %418 = vrot.lane.b32.xlu0 %v1141_v34, %s1053_s18  ;;  %380 = vrot.lane.b32.xlu1 %v1149_v38, %s1052_s17 }
 0x1a3   :  { %454 = vrot.lane.b32.xlu0 %v1139_v33, %s1054_s19  ;;  %416 = vrot.lane.b32.xlu1 %v1145_v36, %s1053_s18 }
 0x1a7   :  { %458 = vrot.lane.b32.xlu0 %v1141_v34, %s1054_s19  ;;  %420 = vrot.lane.b32.xlu1 %v1149_v38, %s1053_s18 }
 0x1ab   :  { %494 = vrot.lane.b32.xlu0 %v1139_v33, %s1055_s20  ;;  %456 = vrot.lane.b32.xlu1 %v1145_v36, %s1054_s19 }
 0x1af   :  { %498 = vrot.lane.b32.xlu0 %v1141_v34, %s1055_s20  ;;  %460 = vrot.lane.b32.xlu1 %v1149_v38, %s1054_s19 }
 0x1b3   :  { %534 = vrot.lane.b32.xlu0 %v1139_v33, %s1056_s21  ;;  %496 = vrot.lane.b32.xlu1 %v1145_v36, %s1055_s20 }
 0x1b7   :  { %538 = vrot.lane.b32.xlu0 %v1141_v34, %s1056_s21  ;;  %500 = vrot.lane.b32.xlu1 %v1149_v38, %s1055_s20 }
 0x1bb   :  { %536 = vrot.lane.b32.xlu1 %v1145_v36, %s1056_s21  ;;  %576 = vperm.xlu0 %995, %v1111_v1  }
 0x1bf   :  { %540 = vrot.lane.b32.xlu1 %v1149_v38, %s1056_s21 }
 0x1f1   :  { %v258_v41 = vpop.permute.xlu0 %257  ;;  %v254_v42 = vpop.permute.xlu1 %253 }
 0x1f5   :  { %v295_v44 = vpop.permute.xlu0 %294  ;;  %v256_v46 = vpop.permute.xlu1 %255 }
 0x1f6   :  { %v266_v57 = vsel %vm263_vm1, %v254_v42, %v256_v46  ;;  %v265_v9 = vsel %vm263_vm1, %v256_v46, %v258_v41 }
 0x1f7   :  { %v291_v1 = vmul.f32 %v277_v54, %v266_v57  ;;  %v292_v20 = vmul.f32 %v281_v6, %v265_v9 }
 0x1f9   :  { %v299_v50 = vpop.permute.xlu0 %298  ;;  %v260_v52 = vpop.permute.xlu1 %259 }
 0x1fa   :  { %v264_v7 = vsel %vm263_vm1, %v258_v41, %v260_v52  ;;  %v267_v8 = vsel %vm263_vm1, %v260_v52, %v254_v42  ;;  %v401_v41 = vrot.slane %v924_v27, %v1198_v56  ;;  %v361_v52 = vrot.slane %v923_v26, %v1198_v56 }
 0x1fb   :  { %v290_v16 = vmul.f32 %v273_v58, %v267_v8  ;;  %v293_v17 = vmul.f32 %v285_v61, %v264_v7 }
 0x1fd   :  { %v335_v59 = vpop.permute.xlu0 %334  ;;  %v297_v60 = vpop.permute.xlu1 %296 }
 0x1fe   :  { %v305_v63 = vsel %vm302_vm2, %v295_v44, %v297_v60  ;;  %v304_v2 = vsel %vm302_vm2, %v297_v60, %v299_v50 }
 0x1ff   :  { %v331_v4 = vmul.f32 %v317_v55, %v305_v63  ;;  %v332_v13 = vmul.f32 %v321_v62, %v304_v2 }
 0x201   :  { %v339_v10 = vpop.permute.xlu0 %338  ;;  %v301_v11 = vpop.permute.xlu1 %300  ;;  %v935_v12 = vpack.c.bf16 %v331_v4, %v291_v1  ;;  %v953_v25 = vpack.c.bf16 %v332_v13, %v292_v20 }
 0x202   :  { %v303_v14 = vsel %vm302_vm2, %v299_v50, %v301_v11  ;;  %v306_v15 = vsel %vm302_vm2, %v301_v11, %v295_v44  ;;  %v925_v44 = vld [vmem:[%s1353_s2 + $0x5] ss:$8 sm:$0xf]  ;;  %v405_v50 = vrot.slane %v924_v27, %v1193_v53 }
 0x203   :  { %v330_v18 = vmul.f32 %v313_v0, %v306_v15  ;;  %v333_v19 = vmul.f32 %v325_v5, %v303_v14  ;;  %936 = vmatprep.subr.bf16.mxu0 %v935_v12  ;;  %v433_v62 = vrot.slane %v925_v44, %v1191_v51  ;;  %v437_v2 = vrot.slane %v925_v44, %v1182_v47 }
 0x204   :  { %v441_v15 = vrot.slane %v925_v44, %v1198_v56 }
 0x205   :  { %v937_v21 = vpack.c.bf16 %v330_v18, %v290_v16  ;;  %v375_v22 = vpop.permute.xlu0 %374  ;;  %v337_v23 = vpop.permute.xlu1 %336  ;;  %v951_v24 = vpack.c.bf16 %v333_v19, %v293_v17  ;;  %v445_v18 = vrot.slane %v925_v44, %v1193_v53 }
 0x206   :  { %v345_v32 = vsel %vm342_vm3, %v335_v59, %v337_v23  ;;  %v344_v57 = vsel %vm342_vm3, %v337_v23, %v339_v10 }
 0x207   :  { %938 = vmatpush1.bf16.msra.mxu0 %v937_v21  ;;  %952 = vmatprep.subr.bf16.mxu1 %v951_v24  ;;  %v371_v46 = vmul.f32 %v357_v30, %v345_v32  ;;  %v372_v7 = vmul.f32 %v361_v52, %v344_v57  ;;  %v927_v30 = vld [vmem:[%s1353_s2 + $0x7] ss:$8 sm:$0xf] }
 0x208   :  { %954 = vmatpush1.bf16.msra.mxu1 %v953_v25 }
 0x209   :  { %v379_v28 = vpop.permute.xlu0 %378  ;;  %v341_v29 = vpop.permute.xlu1 %340 }
 0x20a   :  { %v343_v54 = vsel %vm342_vm3, %v339_v10, %v341_v29  ;;  %v346_v55 = vsel %vm342_vm3, %v341_v29, %v335_v59 }
 0x20b   :  { %v370_v59 = vmul.f32 %v353_v35, %v346_v55  ;;  %v373_v4 = vmul.f32 %v365_v40, %v343_v54 }
 0x20d   :  { %v415_v37 = vpop.permute.xlu0 %414  ;;  %v377_v39 = vpop.permute.xlu1 %376 }
 0x20e   :  { %v385_v42 = vsel %vm382_vm4, %v375_v22, %v377_v39  ;;  %v384_v48 = vsel %vm382_vm4, %v377_v39, %v379_v28 }
 0x20f   :  { %v411_v49 = vmul.f32 %v397_v31, %v385_v42  ;;  %v412_v63 = vmul.f32 %v401_v41, %v384_v48  ;;  %v521_v48 = vrot.slane %v927_v30, %v1198_v56 }
 0x211   :  { %v419_v58 = vpop.permute.xlu0 %418  ;;  %v381_v60 = vpop.permute.xlu1 %380  ;;  %v939_v61 = vpack.c.bf16 %v411_v49, %v371_v46  ;;  %v957_v12 = vpack.c.bf16 %v412_v63, %v372_v7  ;;  %v525_v49 = vrot.slane %v927_v30, %v1193_v53 }
 0x212   :  { %v383_v0 = vsel %vm382_vm4, %v379_v28, %v381_v60  ;;  %v386_v1 = vsel %vm382_vm4, %v381_v60, %v375_v22 }
 0x213   :  { %v410_v5 = vmul.f32 %v393_v43, %v386_v1  ;;  %v413_v6 = vmul.f32 %v405_v50, %v383_v0  ;;  %940 = vmatprep.subr.bf16.mxu0 %v939_v61 }
 0x215   :  { %v941_v8 = vpack.c.bf16 %v410_v5, %v370_v59  ;;  %v455_v9 = vpop.permute.xlu0 %454  ;;  %v417_v10 = vpop.permute.xlu1 %416  ;;  %v955_v11 = vpack.c.bf16 %v413_v6, %v373_v4 }
 0x216   :  { %v424_v13 = vsel %vm422_vm5, %v417_v10, %v419_v58  ;;  %v425_v14 = vsel %vm422_vm5, %v415_v37, %v417_v10 }
 0x217   :  { %v450_v16 = vmul.f32 %v433_v62, %v425_v14  ;;  %v451_v17 = vmul.f32 %v437_v2, %v424_v13  ;;  %942 = vmatpush1.bf16.msra.mxu0 %v941_v8  ;;  %956 = vmatprep.subr.bf16.mxu1 %v955_v11 }
 0x218   :  { %958 = vmatpush1.bf16.msra.mxu1 %v957_v12 }
 0x219   :  { %v945_v19 = vpack.c.bf16 %v450_v16, %v1139_v33  ;;  %v459_v20 = vpop.permute.xlu0 %458  ;;  %v421_v21 = vpop.permute.xlu1 %420  ;;  %v943_v22 = vpack.c.bf16 %v451_v17, %v1145_v36  ;;  %v926_v36 = vld [vmem:[%s1353_s2 + $0x6] ss:$8 sm:$0xf] }
 0x21a   :  { %v423_v23 = vsel %vm422_vm5, %v419_v58, %v421_v21  ;;  %v426_v24 = vsel %vm422_vm5, %v421_v21, %v415_v37  ;;  %v477_v35 = vrot.slane %v926_v36, %v1182_v47  ;;  %v517_v37 = vrot.slane %v927_v30, %v1182_v47  ;;  %v928_v58 = vld [vmem:[%s1353_s2 + $0x20] ss:$8 sm:$0xf] }
 0x21b   :  { %v452_v25 = vmul.f32 %v441_v15, %v423_v23  ;;  %v453_v26 = vmul.f32 %v445_v18, %v426_v24  ;;  %944 = vmatprep.subr.bf16.mxu0 %v943_v22  ;;  %v481_v41 = vrot.slane %v926_v36, %v1198_v56  ;;  %v485_v42 = vrot.slane %v926_v36, %v1193_v53  ;;  %v574_v17 = vld [vmem:[%s1355_s4] sm:$0xff] }
 0x21c   :  { %946 = vmatpush1.bf16.msra.mxu0 %v945_v19  ;;  %v553_v59 = vrot.slane %v928_v58, %v1191_v51  ;;  %v557_v4 = vrot.slane %v928_v58, %v1182_v47  ;;  %v561_v47 = vrot.slane %v928_v58, %v1198_v56  ;;  %v565_v16 = vrot.slane %v928_v58, %v1193_v53 }
 0x21d   :  { %v961_v27 = vpack.c.bf16 %v452_v25, %v1141_v34  ;;  %v495_v28 = vpop.permute.xlu0 %494  ;;  %v457_v29 = vpop.permute.xlu1 %456  ;;  %v959_v33 = vpack.c.bf16 %v453_v26, %v1149_v38  ;;  %v473_v34 = vrot.slane %v926_v36, %v1191_v51  ;;  %v513_v38 = vrot.slane %v927_v30, %v1191_v51 }
 0x21e   :  { %v464_v39 = vsel %vm462_vm6, %v457_v29, %v459_v20  ;;  %v465_v40 = vsel %vm462_vm6, %v455_v9, %v457_v29 }
 0x21f   :  { %960 = vmatprep.subr.bf16.mxu1 %v959_v33  ;;  %v490_v50 = vmul.f32 %v473_v34, %v465_v40  ;;  %v491_v52 = vmul.f32 %v477_v35, %v464_v39  ;;  %v729_v33 = vld [vmem:[%s1356_s5] sm:$0xff] }
 0x220   :  { %962 = vmatpush1.bf16.msra.mxu1 %v961_v27 }
 0x221   :  { %v499_v31 = vpop.permute.xlu0 %498  ;;  %v461_v32 = vpop.permute.xlu1 %460 }
 0x222   :  { %v463_v60 = vsel %vm462_vm6, %v459_v20, %v461_v32  ;;  %v466_v61 = vsel %vm462_vm6, %v461_v32, %v455_v9  ;;  %v730_v32 = vld [vmem:[%s1356_s5 + $0x8] sm:$0xff]  ;;  %s1018_s5 = scalar_lea.vmem %s905_s16, 1024 }
 0x223   :  { %v492_v5 = vmul.f32 %v481_v41, %v463_v60  ;;  %v493_v6 = vmul.f32 %v485_v42, %v466_v61  ;;  %p1019_p8 = scmp.ne.s32.totalorder %s905_s16, %s1018_s5  ;;  %p1024_p10 = scmp.lt.s32.totalorder %s1018_s5, %s1018_s5 }
 0x225   :  { %v497_v43 = vpop.permute.xlu1 %496  ;;  %v535_v54 = vpop.permute.xlu0 %534  ;;  %p1025_p11 = por %p1024_p10, %p1023_p9 }
 0x226   :  { %v504_v44 = vsel %vm502_vm7, %v497_v43, %v499_v31  ;;  %v505_v46 = vsel %vm502_vm7, %v495_v28, %v497_v43 }
 0x227   :  { %v530_v55 = vmul.f32 %v513_v38, %v505_v46  ;;  %v531_v57 = vmul.f32 %v517_v37, %v504_v44  ;;  %p1026_p12 = pnand %p1025_p11, %p1019_p8 }
 0x229   :  { %v949_v62 = vpack.c.bf16 %v530_v55, %v490_v50  ;;  %v501_v63 = vpop.permute.xlu1 %500  ;;  %v947_v0 = vpack.c.bf16 %v531_v57, %v491_v52  ;;  %v539_v9 = vpop.permute.xlu0 %538 }
 0x22a   :  { %v503_v1 = vsel %vm502_vm7, %v499_v31, %v501_v63  ;;  %v506_v2 = vsel %vm502_vm7, %v501_v63, %v495_v28 }
 0x22b   :  { %v532_v7 = vmul.f32 %v521_v48, %v503_v1  ;;  %v533_v8 = vmul.f32 %v525_v49, %v506_v2  ;;  %948 = vmatprep.subr.bf16.mxu0 %v947_v0 }
 0x22c   :  { %950 = vmatpush1.bf16.msra.mxu0 %v949_v62 }
 0x22d   :  { %v965_v10 = vpack.c.bf16 %v532_v7, %v492_v5  ;;  %v537_v11 = vpop.permute.xlu1 %536  ;;  %v963_v12 = vpack.c.bf16 %v533_v8, %v493_v6 }
 0x22e   :  { %v544_v13 = vsel %vm542_vm8, %v537_v11, %v539_v9  ;;  %v545_v14 = vsel %vm542_vm8, %v535_v54, %v537_v11 }
 0x22f   :  { %v570_v15 = vmul.f32 %v553_v59, %v545_v14  ;;  %v571_v51 = vmul.f32 %v557_v4, %v544_v13  ;;  %964 = vmatprep.subr.bf16.mxu1 %v963_v12 }
 0x230   :  { %966 = vmatpush1.bf16.msra.mxu1 %v965_v10 }
 0x231   :  { %599 = vmatprep.subr.mxu0 %v571_v51  ;;  %v541_v18 = vpop.permute.xlu1 %540 }
 0x232   :  { %v543_v19 = vsel %vm542_vm8, %v539_v9, %v541_v18  ;;  %v546_v20 = vsel %vm542_vm8, %v541_v18, %v535_v54  ;;  %600 = vmatpush1.msra.mxu0 %v570_v15 }
 0x233   :  { %v572_v21 = vmul.f32 %v561_v47, %v543_v19  ;;  %v573_v22 = vmul.f32 %v565_v16, %v546_v20  ;;  %929 = vmatmul.mubr.msk.f32.vlgmr.msra.gmra.mrb[6].mxu0 %vm579_vm9, %v574_v17 }
 0x234   :  { %801 = vmatprep.mubr.f32.mxu0 %v1047_v3 }
 0x235   :  { %670 = vmatprep.subr.mxu1 %v573_v22 }
 0x236   :  { %671 = vmatpush1.msra.mxu1 %v572_v21 }
 0x237   :  { %930 = vmatmul.mubr.msk.f32.vlgmr.msra.gmra.mrb[6].mxu1 %vm579_vm9, %v574_v17 }
 0x238   :  { %878 = vmatprep.mubr.f32.mxu1 %v1047_v3 }
 0x23a   :  { %v577_v53 = vpop.permute.xlu0 %576 }
 0x306   :  { %v649_v56 = vpop.f32.mrb[6].mxu0 }
 0x307   :  { %v650_v23 = vadd.f32 %v649_v56, %v577_v53  ;;  %v651_v24 = vpop.f32.mrb[7].mxu0 }
 0x308   :  { %v652_v25 = vadd.f32 %v651_v24, %v577_v53 }
 0x309   :  { %v725_v26 = vmax.f32 %v650_v23, 0.0 }
 0x30a   :  { %v726_v27 = vmax.f32 %v652_v25, 0.0  ;;  %v720_v45 = vpop.f32.mrb[6].mxu1 }
 0x30b   :  { %v721_v28 = vadd.f32 %v720_v45, %v577_v53  ;;  %v722_v29 = vpop.f32.mrb[7].mxu1 }
 0x30c   :  { %v723_v36 = vadd.f32 %v722_v29, %v577_v53  ;;  %737 = vmatprep.subr.mxu0 %v726_v27 }
 0x30d   :  { %738 = vmatpush1.msra.mxu0 %v725_v26  ;;  %v727_v31 = vmax.f32 %v721_v28, 0.0 }
 0x30e   :  { %v728_v30 = vmax.f32 %v723_v36, 0.0  ;;  %931 = vmatmul.mubr.msk.f32.vlgmr.msra.gmra.mrb[0].mxu0 %vm65_vm0, %v729_v33 }
 0x30f   :  { %807 = vmatprep.mubr.f32.mxu0 %v1047_v3 }
 0x310   :  { %814 = vmatprep.subr.mxu1 %v728_v30 }
 0x311   :  { %815 = vmatpush1.msra.mxu1 %v727_v31 }
 0x312   :  { %932 = vmatmul.mubr.msk.f32.gmra.mrb[2].mxu0 %vm65_vm0, %v730_v32  ;;  %933 = vmatmul.mubr.msk.f32.vlgmr.msra.gmra.mrb[0].mxu1 %vm65_vm0, %v729_v33 }
 0x313   :  { %884 = vmatprep.mubr.f32.mxu1 %v1047_v3 }
 0x316   :  { %934 = vmatmul.mubr.msk.f32.gmra.mrb[2].mxu1 %vm65_vm0, %v730_v32 }
 0x3e1   :  { %v803_v34 = vpop.f32.mrb[0].mxu0 }
 0x3e2   :  { %891 = vst [vmem:[#allocation5] sm:$0xff] %v803_v34  ;;  %v805_v35 = vpop.f32.mrb[1].mxu0 }
 0x3e3   :  { %892 = vst [vmem:[#allocation5 + $0x8] sm:$0xff] %v805_v35 }
 0x3e5   :  { %v809_v38 = vpop.f32.mrb[2].mxu0  ;;  %v880_v37 = vpop.f32.mrb[0].mxu1 }
 0x3e6   :  { %895 = vst [vmem:[#allocation5 + $0x20] sm:$0xff] %v809_v38  ;;  %893 = vst [vmem:[#allocation5 + $0x10] sm:$0xff] %v880_v37  ;;  %v811_v39 = vpop.f32.mrb[3].mxu0  ;;  %v882_v40 = vpop.f32.mrb[1].mxu1 }
 0x3e7   :  { %896 = vst [vmem:[#allocation5 + $0x28] sm:$0xff] %v811_v39  ;;  %894 = vst [vmem:[#allocation5 + $0x18] sm:$0xff] %v882_v40 }
 0x3e9   :  { %v886_v41 = vpop.f32.mrb[2].mxu1 }
 0x3ea   :  { %897 = vst [vmem:[#allocation5 + $0x30] sm:$0xff] %v886_v41  ;;  %v888_v3 = vpop.f32.mrb[3].mxu1 }
 0x3eb   :  { %898 = vst [vmem:[#allocation5 + $0x38] sm:$0xff] %v888_v3 }
 0x3ec   :  { %1029 = shalt.err (!%p1026_p12)
}
 0x3ed   :  { %s1030_s19 = scalar_lea.hbm %s1357_s6, 1024 }
 0x3ee   :  { %p1031_p13 = scmp.ne.s32.totalorder %s1357_s6, %s1030_s19  ;;  %p1034_p0 = scmp.lt.u32.totalorder %s1030_s19, %s1357_s6 }
 0x3f0   :  { %p1036_p1 = pnand %p1034_p0, %p1031_p13 }
 0x3f2   :  { %1039 = shalt.err (!%p1036_p1)
}
 0x3f3   :  { %s1059_s24 = smov 512   ;;  %s1060_s25 = smov 32  }
 0x3f4   :  { %910 = dma.vmem_to_hbm [thread:$0]  %s905_s16, 1024, %s1357_s6, [#allocation4], %s1059_s24, %s1059_s24, %s1060_s25  }
 0x3f5   :  { %1042 = dma.done.wait [#allocation4], 1024  }
 0x3f6   :  { %1043 = vsyncadd [#allocation4], 4294966272 }
 0x3f7   :  { %914 = vsyncpa [#allocation3], 1 }
 0x3f8   :  { %915 = vsyncpa [#allocation4], 1 }

</bundles_post_ra>
